<compile_context>
chip_gen: v6e
topology: v6e:2x2x1
jax: 0.10.0
libtpu: 0.0.40
codegen_flags: <defaults>
</compile_context>

<pallas_src>
import functools
import math

import jax
import jax.numpy as jnp
from jax.experimental import pallas as pl
from jax.experimental.pallas import tpu as pltpu

LANE = 128
SUBLANE = 8
MAX_BATCH_TILE = 512  # per-grid-step overhead ~0.35us; big tiles fill the MXU M dim


def _round_up(n, m):
    return ((n + m - 1) // m) * m


def _pad_dim(d):
    # 128-lane alignment: exact fit for v5e's 4x128x128 MXU, lane-dense stores
    # everywhere, and no extra padding waste for sub-128 real dims.
    # TODO(synk): optionally 256-align layers whose true width is >=128 on
    # v6e/v7x (2x256x256 MXU) for higher per-pass MXU utilization.
    return _round_up(max(int(d), 1), LANE)


# ---------------------------------------------------------------------------
# Fused kernel: the whole FCNet forward for one batch tile, all layers.
# ---------------------------------------------------------------------------
def _fcnet_fused_kernel(num_layers, *refs):
    """refs = (x, w_0, b_0, ..., w_{L-1}, b_{L-1}, o).

    h_{l+1} = relu(h_l @ W_l + b_l), where W_l already includes the
    weight-norm(dim=None) scale g/||V||_F and is stored bf16.  The matmul runs
    bf16 on the MXU with an f32 accumulator; bias and ReLU are applied in f32.
    Activations never leave the core between layers.
    """
    x_ref, o_ref = refs[0], refs[-1]
    h = x_ref[...]                       # (TB, Din_p) f32
    for l in range(num_layers):          # static Python loop, L is small
        w_ref = refs[1 + 2 * l]          # (Din_p, Dout_p) bf16
        b_ref = refs[2 + 2 * l]          # (1, Dout_p)     f32
        y = jnp.dot(h.astype(jnp.bfloat16), w_ref[...],
                    preferred_element_type=jnp.float32)
        h = jnp.maximum(y + b_ref[...], 0.0)
    o_ref[...] = h.astype(o_ref.dtype)


# ---------------------------------------------------------------------------
# Parameter setup (mirrors FCNet.__init__ with weight_norm(dim=None)).
# ---------------------------------------------------------------------------
def init_fcnet_params(key, dims, norm=True):
    params = []
    for i in range(len(dims) - 1):
        in_dim, out_dim = dims[i], dims[i + 1]
        key, k_v, k_b = jax.random.split(key, 3)
        bound = 1.0 / math.sqrt(in_dim)
        v = jax.random.uniform(k_v, (out_dim, in_dim), jnp.float32, -bound, bound)
        b = jax.random.uniform(k_b, (out_dim,), jnp.float32, -bound, bound)
        g = jnp.sqrt(jnp.sum(v * v)) if norm else None  # weight_norm init: g = ||v||_F
        params.append({"v": v, "g": g, "b": b})
    return params


def pack_fcnet_params(params, dims, norm=True):
    """One-time packing for the fused kernel.

    weight_norm(dim=None): W_eff = g * V / ||V||_F -- a single scalar per
    layer, folded directly into the packed bf16 weights (numerically
    equivalent, removes the in-kernel VPU multiply and SMEM prefetch).
    Each layer keeps its own lane-rounded (Din_p, Dout_p) shape; padded input
    rows are zero weights and padded output lanes get zero bias, so padded
    lanes stay exactly 0 through every ReLU.
    """
    weights, biases = [], []
    for layer in params:
        v, g, bias = layer["v"], layer["g"], layer["b"]
        out_dim, in_dim = v.shape
        din_p, dout_p = _pad_dim(in_dim), _pad_dim(out_dim)
        s = (g / jnp.sqrt(jnp.sum(v * v))) if norm else jnp.float32(1.0)
        w_eff = (v.T * s).astype(jnp.float32)               # (in, out)
        w = jnp.zeros((din_p, dout_p), jnp.float32).at[:in_dim, :out_dim].set(w_eff)
        b = jnp.zeros((1, dout_p), jnp.float32).at[0, :out_dim].set(bias)
        weights.append(w.astype(jnp.bfloat16))               # MXU-native dtype
        biases.append(b)
    return {"weights": weights, "biases": biases,
            "in_dim": dims[0], "out_dim": dims[-1]}


# ---------------------------------------------------------------------------
# Forward: one fused pallas_call over batch tiles.
# ---------------------------------------------------------------------------
def _choose_batch_tile(batch):
    b8 = _round_up(batch, SUBLANE)
    # Aim for >=2 grid steps so the "parallel" batch axis can shard across both
    # v7x TensorCores, with a 512-row tile cap for MXU/overhead balance.
    n_tiles = max(2, pl.cdiv(b8, MAX_BATCH_TILE))
    tb = min(MAX_BATCH_TILE, _round_up(pl.cdiv(b8, n_tiles), SUBLANE))
    b_pad = _round_up(b8, tb)
    return tb, b_pad


def _interleave(weights, biases):
    flat = []
    for w, b in zip(weights, biases):
        flat.extend((w, b))
    return flat


def _build_fcnet_call(weights, biases, tb, b_pad, single_buffer_weights):
    num_layers = len(weights)
    din0 = weights[0].shape[0]
    dlast = weights[-1].shape[1]

    wb_kwargs = {}
    if single_buffer_weights:
        # Grid-invariant blocks (constant index_map -> DMA'd once); default
        # double-buffering would only duplicate the slab in VMEM.
        wb_kwargs["pipeline_mode"] = pl.Buffered(1)

    in_specs = [pl.BlockSpec((tb, din0), lambda i: (i, 0))]        # activations
    for w, b in zip(weights, biases):
        in_specs.append(pl.BlockSpec(w.shape, lambda i: (0, 0), **wb_kwargs))
        in_specs.append(pl.BlockSpec(b.shape, lambda i: (0, 0), **wb_kwargs))

    # Explicit VMEM budget (v7x only has 64 MiB per TensorCore): weight/bias
    # slabs with their requested buffer count + double-buffered activation
    # in/out tiles + live f32/bf16 intermediates, plus headroom.  For models
    # whose weight slab alone exceeds ~40 MiB, split layers onto a grid axis
    # instead of one monolithic resident slab.
    wb_bufs = 1 if single_buffer_weights else 2
    w_bytes = sum(w.size * w.dtype.itemsize for w in weights) * wb_bufs
    b_bytes = sum(b.size * b.dtype.itemsize for b in biases) * wb_bufs
    io_bytes = 2 * tb * din0 * 4 + 2 * tb * dlast * 4
    act_bytes = 3 * tb * max(max(w.shape) for w in weights) * 4
    vmem_limit = int(min(112 << 20,
                         max(16 << 20,
                             w_bytes + b_bytes + io_bytes + act_bytes + (4 << 20))))

    return pl.pallas_call(
        functools.partial(_fcnet_fused_kernel, num_layers),
        out_shape=jax.ShapeDtypeStruct((b_pad, dlast), jnp.float32),
        grid_spec=pltpu.PrefetchScalarGridSpec(
            num_scalar_prefetch=0,
            grid=(b_pad // tb,),                              # batch tiles
            in_specs=in_specs,
            out_specs=pl.BlockSpec((tb, dlast), lambda i: (i, 0)),
        ),
        compiler_params=pltpu.CompilerParams(
            dimension_semantics=("parallel",),                # megacore on v7x
            vmem_limit_bytes=vmem_limit,
        ),
    )


def fcnet_forward(packed, x):
    weights, biases = packed["weights"], packed["biases"]
    in_dim, out_dim = packed["in_dim"], packed["out_dim"]
    din0 = weights[0].shape[0]
    batch = x.shape[0]

    tb, b_pad = _choose_batch_tile(batch)
    x_pad = jnp.zeros((b_pad, din0), jnp.float32).at[:batch, :in_dim].set(
        x.astype(jnp.float32))
    flat_params = _interleave(weights, biases)

    try:
        out_pad = _build_fcnet_call(weights, biases, tb, b_pad, True)(
            x_pad, *flat_params)
    except Exception:
        # Fallback for JAX versions that reject Buffered(1) on the main
        # pipeline; only costs the second (redundant) weight buffer in VMEM.
        out_pad = _build_fcnet_call(weights, biases, tb, b_pad, False)(
            x_pad, *flat_params)

    return out_pad[:batch, :out_dim]


# ---------------------------------------------------------------------------
# Pure-JAX f32 reference (matches the PyTorch module) for correctness check.
# ---------------------------------------------------------------------------
def fcnet_forward_ref(params, x, norm=True):
    for layer in params:
        v, g, b = layer["v"], layer["g"], layer["b"]
        w_eff = (g * v / jnp.sqrt(jnp.sum(v * v))) if norm else v
        x = jnp.maximum(x @ w_eff.T + b, 0.0)
    return x


if __name__ == "__main__":
    key = jax.random.PRNGKey(0)
    k_params, k_x = jax.random.split(key)

    dims = [16, 32, 32]   # FCNet(dims=[16, 32, 32]) -> 2 x (weight_norm Linear + ReLU)
    batch = 8

    params = init_fcnet_params(k_params, dims, norm=True)
    packed = pack_fcnet_params(params, dims, norm=True)
    x = jax.random.normal(k_x, (batch, dims[0]), jnp.float32)

    out = fcnet_forward(packed, x)
    out = jax.block_until_ready(out)

    ref = fcnet_forward_ref(params, x, norm=True)
    assert out.shape == (batch, dims[-1])
    # bf16 MXU inputs with f32 accumulation -> loosened tolerance vs f32 ref.
    assert jnp.allclose(out, ref, atol=5e-2, rtol=5e-2), "mismatch vs reference"

    print("KERNEL_OK")
</pallas_src>

<mosaic_0001>
module attributes {stable_mosaic.version = 11 : i64} {
  func.func @_fcnet_fused_kernel(%arg0: i32, %arg1: memref<8x128xf32, #tpu.memory_space<vmem>>, %arg2: memref<128x128xbf16, #tpu.memory_space<vmem>>, %arg3: memref<1x128xf32, #tpu.memory_space<vmem>>, %arg4: memref<128x128xbf16, #tpu.memory_space<vmem>>, %arg5: memref<1x128xf32, #tpu.memory_space<vmem>>, %arg6: memref<8x128xf32, #tpu.memory_space<vmem>>) attributes {dimension_semantics = [#tpu.dimension_semantics<parallel>], iteration_bounds = array<i64: 1>, scalar_prefetch = 0 : i64, scratch_operands = 0 : i64, tpu.core_type = #tpu.core_type<tc>, window_params = [{transform_indices = @transform_0, window_bounds = array<i64: 8, 128>}, {pipeline_mode = #tpu.pipeline_mode<synchronous>, transform_indices = @transform_1, window_bounds = array<i64: 128, 128>}, {pipeline_mode = #tpu.pipeline_mode<synchronous>, transform_indices = @transform_2, window_bounds = array<i64: 1, 128>}, {pipeline_mode = #tpu.pipeline_mode<synchronous>, transform_indices = @transform_3, window_bounds = array<i64: 128, 128>}, {pipeline_mode = #tpu.pipeline_mode<synchronous>, transform_indices = @transform_4, window_bounds = array<i64: 1, 128>}, {transform_indices = @transform_5, window_bounds = array<i64: 8, 128>}]} {
    %c0 = arith.constant 0 : index
    %c0_0 = arith.constant 0 : index
    %0 = vector.load %arg1[%c0, %c0_0] : memref<8x128xf32, #tpu.memory_space<vmem>>, vector<8x128xf32>
    %1 = arith.truncf %0 : vector<8x128xf32> to vector<8x128xbf16>
    %c0_1 = arith.constant 0 : index
    %c0_2 = arith.constant 0 : index
    %2 = vector.load %arg2[%c0_1, %c0_2] : memref<128x128xbf16, #tpu.memory_space<vmem>>, vector<128x128xbf16>
    %cst = arith.constant dense<0.000000e+00> : vector<8x128xf32>
    %3 = tpu.matmul %1, %2, %cst {dimension_numbers = #tpu.dot_dimension_numbers<[1], [0], [0], [1], [0, 0, 1, 1], [], []>} : vector<8x128xbf16>, vector<128x128xbf16>, vector<8x128xf32> -> vector<8x128xf32>
    %c0_3 = arith.constant 0 : index
    %c0_4 = arith.constant 0 : index
    %4 = vector.load %arg3[%c0_3, %c0_4] : memref<1x128xf32, #tpu.memory_space<vmem>>, vector<1x128xf32>
    %5 = vector.broadcast %4 : vector<1x128xf32> to vector<8x128xf32>
    %6 = arith.addf %3, %5 : vector<8x128xf32>
    %cst_5 = arith.constant 0.000000e+00 : f32
    %7 = vector.broadcast %cst_5 : f32 to vector<8x128xf32>
    %8 = arith.maximumf %6, %7 : vector<8x128xf32>
    %9 = arith.truncf %8 : vector<8x128xf32> to vector<8x128xbf16>
    %c0_6 = arith.constant 0 : index
    %c0_7 = arith.constant 0 : index
    %10 = vector.load %arg4[%c0_6, %c0_7] : memref<128x128xbf16, #tpu.memory_space<vmem>>, vector<128x128xbf16>
    %cst_8 = arith.constant dense<0.000000e+00> : vector<8x128xf32>
    %11 = tpu.matmul %9, %10, %cst_8 {dimension_numbers = #tpu.dot_dimension_numbers<[1], [0], [0], [1], [0, 0, 1, 1], [], []>} : vector<8x128xbf16>, vector<128x128xbf16>, vector<8x128xf32> -> vector<8x128xf32>
    %c0_9 = arith.constant 0 : index
    %c0_10 = arith.constant 0 : index
    %12 = vector.load %arg5[%c0_9, %c0_10] : memref<1x128xf32, #tpu.memory_space<vmem>>, vector<1x128xf32>
    %13 = vector.broadcast %12 : vector<1x128xf32> to vector<8x128xf32>
    %14 = arith.addf %11, %13 : vector<8x128xf32>
    %cst_11 = arith.constant 0.000000e+00 : f32
    %15 = vector.broadcast %cst_11 : f32 to vector<8x128xf32>
    %16 = arith.maximumf %14, %15 : vector<8x128xf32>
    %c0_12 = arith.constant 0 : index
    %c0_13 = arith.constant 0 : index
    %17 = vector.load %arg6[%c0_12, %c0_13] : memref<8x128xf32, #tpu.memory_space<vmem>>, vector<8x128xf32>
    tpu.vector_store %arg6[%c0_12, %c0_13], %16 {strides = array<i32>} : memref<8x128xf32, #tpu.memory_space<vmem>>, vector<8x128xf32>,
    return
  }
  func.func @transform_0(%arg0: i32) -> (i32, i32) {
    %c0_i32 = arith.constant 0 : i32
    %c0_i32_0 = arith.constant 0 : i32
    return %arg0, %c0_i32 : i32, i32
  }
  func.func @transform_1(%arg0: i32) -> (i32, i32) {
    %c0_i32 = arith.constant 0 : i32
    %c0_i32_0 = arith.constant 0 : i32
    %c0_i32_1 = arith.constant 0 : i32
    return %c0_i32, %c0_i32_0 : i32, i32
  }
  func.func @transform_2(%arg0: i32) -> (i32, i32) {
    %c0_i32 = arith.constant 0 : i32
    %c0_i32_0 = arith.constant 0 : i32
    %c0_i32_1 = arith.constant 0 : i32
    return %c0_i32, %c0_i32_0 : i32, i32
  }
  func.func @transform_3(%arg0: i32) -> (i32, i32) {
    %c0_i32 = arith.constant 0 : i32
    %c0_i32_0 = arith.constant 0 : i32
    %c0_i32_1 = arith.constant 0 : i32
    return %c0_i32, %c0_i32_0 : i32, i32
  }
  func.func @transform_4(%arg0: i32) -> (i32, i32) {
    %c0_i32 = arith.constant 0 : i32
    %c0_i32_0 = arith.constant 0 : i32
    %c0_i32_1 = arith.constant 0 : i32
    return %c0_i32, %c0_i32_0 : i32, i32
  }
  func.func @transform_5(%arg0: i32) -> (i32, i32) {
    %c0_i32 = arith.constant 0 : i32
    %c0_i32_0 = arith.constant 0 : i32
    return %arg0, %c0_i32 : i32, i32
  }
}

module attributes {stable_mosaic.version = 11 : i64} {
  func.func @_fcnet_fused_kernel(%arg0: i32, %arg1: memref<8x128xf32, #tpu.memory_space<vmem>>, %arg2: memref<128x128xbf16, #tpu.memory_space<vmem>>, %arg3: memref<1x128xf32, #tpu.memory_space<vmem>>, %arg4: memref<128x128xbf16, #tpu.memory_space<vmem>>, %arg5: memref<1x128xf32, #tpu.memory_space<vmem>>, %arg6: memref<8x128xf32, #tpu.memory_space<vmem>>) attributes {dimension_semantics = [#tpu.dimension_semantics<parallel>], iteration_bounds = array<i64: 1>, scalar_prefetch = 0 : i64, scratch_operands = 0 : i64, tpu.core_type = #tpu.core_type<tc>, window_params = [{transform_indices = @transform_0, window_bounds = array<i64: 8, 128>}, {pipeline_mode = #tpu.pipeline_mode<synchronous>, transform_indices = @transform_1, window_bounds = array<i64: 128, 128>}, {pipeline_mode = #tpu.pipeline_mode<synchronous>, transform_indices = @transform_2, window_bounds = array<i64: 1, 128>}, {pipeline_mode = #tpu.pipeline_mode<synchronous>, transform_indices = @transform_3, window_bounds = array<i64: 128, 128>}, {pipeline_mode = #tpu.pipeline_mode<synchronous>, transform_indices = @transform_4, window_bounds = array<i64: 1, 128>}, {transform_indices = @transform_5, window_bounds = array<i64: 8, 128>}]} {
    %c0 = arith.constant 0 : index
    %c0_0 = arith.constant 0 : index
    %0 = vector.load %arg1[%c0, %c0_0] : memref<8x128xf32, #tpu.memory_space<vmem>>, vector<8x128xf32>
    %1 = arith.truncf %0 : vector<8x128xf32> to vector<8x128xbf16>
    %c0_1 = arith.constant 0 : index
    %c0_2 = arith.constant 0 : index
    %2 = vector.load %arg2[%c0_1, %c0_2] : memref<128x128xbf16, #tpu.memory_space<vmem>>, vector<128x128xbf16>
    %cst = arith.constant dense<0.000000e+00> : vector<8x128xf32>
    %3 = tpu.matmul %1, %2, %cst {dimension_numbers = #tpu.dot_dimension_numbers<[1], [0], [0], [1], [0, 0, 1, 1], [], []>} : vector<8x128xbf16>, vector<128x128xbf16>, vector<8x128xf32> -> vector<8x128xf32>
    %c0_3 = arith.constant 0 : index
    %c0_4 = arith.constant 0 : index
    %4 = vector.load %arg3[%c0_3, %c0_4] : memref<1x128xf32, #tpu.memory_space<vmem>>, vector<1x128xf32>
    %5 = vector.broadcast %4 : vector<1x128xf32> to vector<8x128xf32>
    %6 = arith.addf %3, %5 : vector<8x128xf32>
    %cst_5 = arith.constant 0.000000e+00 : f32
    %7 = vector.broadcast %cst_5 : f32 to vector<8x128xf32>
    %8 = arith.maximumf %6, %7 : vector<8x128xf32>
    %9 = arith.truncf %8 : vector<8x128xf32> to vector<8x128xbf16>
    %c0_6 = arith.constant 0 : index
    %c0_7 = arith.constant 0 : index
    %10 = vector.load %arg4[%c0_6, %c0_7] : memref<128x128xbf16, #tpu.memory_space<vmem>>, vector<128x128xbf16>
    %cst_8 = arith.constant dense<0.000000e+00> : vector<8x128xf32>
    %11 = tpu.matmul %9, %10, %cst_8 {dimension_numbers = #tpu.dot_dimension_numbers<[1], [0], [0], [1], [0, 0, 1, 1], [], []>} : vector<8x128xbf16>, vector<128x128xbf16>, vector<8x128xf32> -> vector<8x128xf32>
    %c0_9 = arith.constant 0 : index
    %c0_10 = arith.constant 0 : index
    %12 = vector.load %arg5[%c0_9, %c0_10] : memref<1x128xf32, #tpu.memory_space<vmem>>, vector<1x128xf32>
    %13 = vector.broadcast %12 : vector<1x128xf32> to vector<8x128xf32>
    %14 = arith.addf %11, %13 : vector<8x128xf32>
    %cst_11 = arith.constant 0.000000e+00 : f32
    %15 = vector.broadcast %cst_11 : f32 to vector<8x128xf32>
    %16 = arith.maximumf %14, %15 : vector<8x128xf32>
    %c0_12 = arith.constant 0 : index
    %c0_13 = arith.constant 0 : index
    %17 = vector.load %arg6[%c0_12, %c0_13] : memref<8x128xf32, #tpu.memory_space<vmem>>, vector<8x128xf32>
    tpu.vector_store %arg6[%c0_12, %c0_13], %16 {strides = array<i32>} : memref<8x128xf32, #tpu.memory_space<vmem>>, vector<8x128xf32>,
    return
  }
  func.func @transform_0(%arg0: i32) -> (i32, i32) {
    %c0_i32 = arith.constant 0 : i32
    %c0_i32_0 = arith.constant 0 : i32
    return %arg0, %c0_i32 : i32, i32
  }
  func.func @transform_1(%arg0: i32) -> (i32, i32) {
    %c0_i32 = arith.constant 0 : i32
    %c0_i32_0 = arith.constant 0 : i32
    %c0_i32_1 = arith.constant 0 : i32
    return %c0_i32, %c0_i32_0 : i32, i32
  }
  func.func @transform_2(%arg0: i32) -> (i32, i32) {
    %c0_i32 = arith.constant 0 : i32
    %c0_i32_0 = arith.constant 0 : i32
    %c0_i32_1 = arith.constant 0 : i32
    return %c0_i32, %c0_i32_0 : i32, i32
  }
  func.func @transform_3(%arg0: i32) -> (i32, i32) {
    %c0_i32 = arith.constant 0 : i32
    %c0_i32_0 = arith.constant 0 : i32
    %c0_i32_1 = arith.constant 0 : i32
    return %c0_i32, %c0_i32_0 : i32, i32
  }
  func.func @transform_4(%arg0: i32) -> (i32, i32) {
    %c0_i32 = arith.constant 0 : i32
    %c0_i32_0 = arith.constant 0 : i32
    %c0_i32_1 = arith.constant 0 : i32
    return %c0_i32, %c0_i32_0 : i32, i32
  }
  func.func @transform_5(%arg0: i32) -> (i32, i32) {
    %c0_i32 = arith.constant 0 : i32
    %c0_i32_0 = arith.constant 0 : i32
    return %arg0, %c0_i32 : i32, i32
  }
}

</mosaic_0001>

<bundles_post_ra>
// kernel: tpu_custom_call.1
= control target key start
LH: loop header
LB: loop body
LE: loop exit
PB: predicated region body
PF: predicated region fallthrough
CT: control target
= control target key end

     0   :  { %10 = vsyncpa [#allocation3], 0  ;;  %s547_s0 = inlined_call_operand.hbm [shape: f32[8,128], index: 0, kind: input, shape index: {}]   ;;  %s548_s1 = inlined_call_operand.hbm [shape: bf16[128,128], index: 1, kind: input, shape index: {}]   ;;  %s549_s2 = inlined_call_operand.vmem [shape: f32[1,128], index: 2, kind: input, shape index: {}]   ;;  %s550_s3 = inlined_call_operand.hbm [shape: bf16[128,128], index: 3, kind: input, shape index: {}]   ;;  %s551_s4 = inlined_call_operand.vmem [shape: f32[1,128], index: 4, kind: input, shape index: {}]   ;;  %s552_s5 = inlined_call_operand.hbm [shape: f32[8,128], index: 5, kind: output, shape index: {}]  }
   0x1   :  { %11 = vsyncpa [#allocation6], 0 }
   0x2   :  { %12 = vsyncpa [#allocation4], 0  ;;  %s491_s18 = smov [#allocation5]  }
   0x3   :  { %s28_s19 = sshll.u32 %s491_s18, 4  ;;  %s29_s19 = int_to_ptr.vmem [resolvable:$true] %s28_s19 }
   0x4   :  { %s413_s20 = scalar_lea.vmem %s29_s19, 1024  ;;  %p418_p1 = scmp.lt.s32.totalorder %s29_s19, %s29_s19 }
   0x5   :  { %p414_p0 = scmp.ne.s32.totalorder %s29_s19, %s413_s20  ;;  %p419_p2 = scmp.lt.s32.totalorder %s413_s20, %s413_s20 }
   0x7   :  { %p420_p3 = por %p419_p2, %p418_p1 }
   0x9   :  { %p421_p4 = pnand %p420_p3, %p414_p0 }
   0xb   :  { %424 = shalt.err (!%p421_p4)
}
   0xc   :  { %s492_s21 = smov 64   ;;  %s493_s22 = smov 4  }
   0xd   :  { %34 = dma.hbm_to_vmem [thread:$0]  %s548_s1, 1024, %s29_s19, [#allocation6], %s492_s21, %s492_s21, %s493_s22  }
   0xe   :  { %s494_s25 = smov [#allocation2]   ;;  %s495_s27 = smov [#allocation7]  }
   0xf   :  { %s19_s26 = sshll.u32 %s494_s25, 4  ;;  %s42_s28 = sshll.u32 %s495_s27, 4  ;;  %s20_s26 = int_to_ptr.vmem [resolvable:$true] %s19_s26  ;;  %s43_s28 = int_to_ptr.vmem [resolvable:$true] %s42_s28 }
  0x10   :  { %s433_s29 = scalar_lea.vmem %s20_s26, 128  ;;  %p438_p6 = scmp.lt.s32.totalorder %s20_s26, %s20_s26 }
  0x11   :  { %p434_p5 = scmp.ne.s32.totalorder %s20_s26, %s433_s29  ;;  %p439_p7 = scmp.lt.s32.totalorder %s433_s29, %s433_s29 }
  0x13   :  { %p440_p8 = por %p439_p7, %p438_p6 }
  0x15   :  { %p441_p9 = pnand %p440_p8, %p434_p5 }
  0x17   :  { %444 = shalt.err (!%p441_p9)
}
  0x18   :  { %22 = dma.hbm_to_vmem [thread:$0]  %s547_s0, 128, %s20_s26, [#allocation3]  }
  0x19   :  { %s453_s7 = scalar_lea.vmem %s43_s28, 1024  ;;  %p458_p11 = scmp.lt.s32.totalorder %s43_s28, %s43_s28 }
  0x1a   :  { %p454_p10 = scmp.ne.s32.totalorder %s43_s28, %s453_s7  ;;  %p459_p12 = scmp.lt.s32.totalorder %s453_s7, %s453_s7 }
  0x1c   :  { %p460_p13 = por %p459_p12, %p458_p11 }
  0x1e   :  { %p461_p0 = pnand %p460_p13, %p454_p10 }
  0x20   :  { %464 = shalt.err (!%p461_p0)
}
  0x21   :  { %48 = dma.hbm_to_vmem [thread:$0]  %s550_s3, 1024, %s43_s28, [#allocation6], %s492_s21, %s492_s21, %s493_s22  }
  0x22   :  { %485 = dma.done.wait [#allocation3], 128  }
  0x23   :  { %486 = vsyncadd [#allocation3], 4294967168 }
  0x24   :  { %487 = dma.done.wait [#allocation6], 2048  }
  0x25   :  { %488 = vsyncadd [#allocation6], 4294965248  ;;  %v496_v0 = vmov 0.0   ;;  %vm497_vm0 = vmmov 0   ;;  %v389_v1 = vld [vmem:[#allocation5 + $0x38] sm:$0xff]   ;;  %v390_v2 = vld [vmem:[#allocation5 + $0x30] sm:$0xff]  }
  0x26   :  { %341 = vmatprep.subr.bf16.mxu0 %v496_v0  ;;  %357 = vmatprep.mubr.msk.bf16.mxu0 %vm497_vm0, %v496_v0  ;;  %v391_v3 = vld [vmem:[#allocation5 + $0x28] sm:$0xff]   ;;  %v397_v4 = vld [vmem:[#allocation7 + $0x38] sm:$0xff]   ;;  %v392_v5 = vld [vmem:[#allocation5 + $0x20] sm:$0xff]   ;;  %s498_s11 = smov [#allocation8]  }
  0x27   :  { %361 = vmatprep.subr.bf16.mxu1 %v496_v0  ;;  %377 = vmatprep.mubr.msk.bf16.mxu1 %vm497_vm0, %v496_v0  ;;  %v398_v6 = vld [vmem:[#allocation7 + $0x30] sm:$0xff]   ;;  %v393_v7 = vld [vmem:[#allocation5 + $0x18] sm:$0xff]   ;;  %v399_v8 = vld [vmem:[#allocation7 + $0x28] sm:$0xff]   ;;  %s295_s12 = sshll.u32 %s498_s11, 4  ;;  %s296_s12 = int_to_ptr.vmem [resolvable:$true] %s295_s12 }
  0x28   :  { %342 = vmatpush3.bf16.msra.mxu0 %v389_v1  ;;  %362 = vmatpush3.bf16.msra.mxu1 %v397_v4  ;;  %v394_v9 = vld [vmem:[#allocation5 + $0x10] sm:$0xff]   ;;  %v400_v10 = vld [vmem:[#allocation7 + $0x20] sm:$0xff]   ;;  %v395_v11 = vld [vmem:[#allocation5 + $0x8] sm:$0xff]   ;;  %p470_p2 = scmp.lt.s32.totalorder %s296_s12, %s296_s12 }
  0x29   :  { %343 = vmatprep.subr.bf16.mxu0 %v496_v0  ;;  %363 = vmatprep.subr.bf16.mxu1 %v496_v0  ;;  %v401_v12 = vld [vmem:[#allocation7 + $0x18] sm:$0xff]   ;;  %v396_v13 = vld [vmem:[#allocation5] sm:$0xff]   ;;  %v402_v15 = vld [vmem:[#allocation7 + $0x10] sm:$0xff]  }
  0x2a   :  { %v61_v14 = vld [vmem:[#allocation2] sm:$0xff]  ;;  %v403_v17 = vld [vmem:[#allocation7 + $0x8] sm:$0xff]   ;;  %v404_v18 = vld [vmem:[#allocation7] sm:$0xff]  }
  0x2b   :  { %v62_v16 = vpack.c.bf16 %v61_v14, %v61_v14  ;;  %v305_v19 = vld [vmem:[%s549_s2] ss:$0 sm:$0xff]  ;;  %s465_s2 = scalar_lea.vmem %s296_s12, 128 }
  0x2c   :  { %344 = vmatpush3.bf16.msra.mxu0 %v390_v2  ;;  %364 = vmatpush3.bf16.msra.mxu1 %v398_v6  ;;  %v314_v27 = vld [vmem:[%s551_s4] ss:$0 sm:$0xff]  ;;  %p466_p1 = scmp.ne.s32.totalorder %s296_s12, %s465_s2  ;;  %p471_p3 = scmp.lt.s32.totalorder %s465_s2, %s465_s2 }
  0x2d   :  { %345 = vmatprep.subr.bf16.mxu0 %v496_v0  ;;  %365 = vmatprep.subr.bf16.mxu1 %v496_v0 }
  0x2e   :  { %p472_p4 = por %p471_p3, %p470_p2 }
  0x30   :  { %346 = vmatpush3.bf16.msra.mxu0 %v391_v3  ;;  %366 = vmatpush3.bf16.msra.mxu1 %v399_v8  ;;  %p473_p5 = pnand %p472_p4, %p466_p1 }
  0x31   :  { %347 = vmatprep.subr.bf16.mxu0 %v496_v0  ;;  %367 = vmatprep.subr.bf16.mxu1 %v496_v0 }
  0x34   :  { %348 = vmatpush3.bf16.msra.mxu0 %v392_v5  ;;  %368 = vmatpush3.bf16.msra.mxu1 %v400_v10 }
  0x35   :  { %349 = vmatprep.subr.bf16.mxu0 %v496_v0  ;;  %369 = vmatprep.subr.bf16.mxu1 %v496_v0 }
  0x38   :  { %350 = vmatpush3.bf16.msra.mxu0 %v393_v7  ;;  %370 = vmatpush3.bf16.msra.mxu1 %v401_v12 }
  0x39   :  { %351 = vmatprep.subr.bf16.mxu0 %v496_v0  ;;  %371 = vmatprep.subr.bf16.mxu1 %v496_v0 }
  0x3c   :  { %352 = vmatpush3.bf16.msra.mxu0 %v394_v9  ;;  %372 = vmatpush3.bf16.msra.mxu1 %v402_v15 }
  0x3d   :  { %353 = vmatprep.subr.bf16.mxu0 %v496_v0  ;;  %373 = vmatprep.subr.bf16.mxu1 %v496_v0 }
  0x40   :  { %354 = vmatpush3.bf16.msra.mxu0 %v395_v11  ;;  %374 = vmatpush3.bf16.msra.mxu1 %v403_v17 }
  0x41   :  { %355 = vmatprep.subr.bf16.mxu0 %v496_v0  ;;  %375 = vmatprep.subr.bf16.mxu1 %v496_v0 }
  0x44   :  { %356 = vmatpush3.bf16.msra.mxu0 %v396_v13  ;;  %376 = vmatpush3.bf16.msra.mxu1 %v404_v18 }
  0x47   :  { %358 = vmatmul.mubr.bf16.vlgmr.msra.gmra.mxu0 %v62_v16 }
 0x107   :  { %v168_v20 = vpop.f32.mrf.mxu0 }
 0x108   :  { %v169_v21 = vadd.f32 %v305_v19, %v168_v20 }
 0x109   :  { %v359_v22 = vpop.f32.mrf.mxu0 }
 0x10a   :  { %v174_v23 = vmax.f32 %v169_v21, 0.0 }
 0x10b   :  { %v171_v24 = vpop.f32.mrf.mxu0 }
 0x10c   :  { %v175_v25 = vpack.c.bf16 %v174_v23, %v174_v23 }
 0x10d   :  { %v360_v26 = vpop.f32.mrf.mxu0 }
 0x10e   :  { %378 = vmatmul.mubr.bf16.vlgmr.msra.gmra.mxu1 %v175_v25 }
 0x1ce   :  { %v281_v28 = vpop.f32.mrf.mxu1 }
 0x1cf   :  { %v282_v29 = vadd.f32 %v314_v27, %v281_v28 }
 0x1d0   :  { %v379_v30 = vpop.f32.mrf.mxu1 }
 0x1d1   :  { %v287_v31 = vmax.f32 %v282_v29, 0.0 }
 0x1d2   :  { %v284_v32 = vpop.f32.mrf.mxu1 }
 0x1d3   :  { %288 = vst [vmem:[#allocation8] sm:$0xff] %v287_v31 }
 0x1d4   :  { %v380_v33 = vpop.f32.mrf.mxu1 }
 0x1d5   :  { %476 = shalt.err (!%p473_p5)
}
 0x1d6   :  { %298 = dma.vmem_to_hbm [thread:$0]  %s296_s12, 128, %s552_s5, [#allocation4]  }
 0x1d7   :  { %489 = dma.done.wait [#allocation4], 128  }
 0x1d8   :  { %490 = vsyncadd [#allocation4], 4294967168 }
 0x1d9   :  { %302 = vsyncpa [#allocation3], 1 }
 0x1da   :  { %303 = vsyncpa [#allocation6], 1 }
 0x1db   :  { %304 = vsyncpa [#allocation4], 1 }

// kernel: tpu_custom_call.1
= control target key start
LH: loop header
LB: loop body
LE: loop exit
PB: predicated region body
PF: predicated region fallthrough
CT: control target
= control target key end

     0   :  { %10 = vsyncpa [#allocation3], 0  ;;  %s547_s0 = inlined_call_operand.hbm [shape: f32[8,128], index: 0, kind: input, shape index: {}]   ;;  %s548_s1 = inlined_call_operand.hbm [shape: bf16[128,128], index: 1, kind: input, shape index: {}]   ;;  %s549_s2 = inlined_call_operand.vmem [shape: f32[1,128], index: 2, kind: input, shape index: {}]   ;;  %s550_s3 = inlined_call_operand.hbm [shape: bf16[128,128], index: 3, kind: input, shape index: {}]   ;;  %s551_s4 = inlined_call_operand.vmem [shape: f32[1,128], index: 4, kind: input, shape index: {}]   ;;  %s552_s5 = inlined_call_operand.hbm [shape: f32[8,128], index: 5, kind: output, shape index: {}]  }
   0x1   :  { %11 = vsyncpa [#allocation6], 0 }
   0x2   :  { %12 = vsyncpa [#allocation4], 0  ;;  %s491_s18 = smov [#allocation5]  }
   0x3   :  { %s28_s19 = sshll.u32 %s491_s18, 4  ;;  %s29_s19 = int_to_ptr.vmem [resolvable:$true] %s28_s19 }
   0x4   :  { %s413_s20 = scalar_lea.vmem %s29_s19, 1024  ;;  %p418_p1 = scmp.lt.s32.totalorder %s29_s19, %s29_s19 }
   0x5   :  { %p414_p0 = scmp.ne.s32.totalorder %s29_s19, %s413_s20  ;;  %p419_p2 = scmp.lt.s32.totalorder %s413_s20, %s413_s20 }
   0x7   :  { %p420_p3 = por %p419_p2, %p418_p1 }
   0x9   :  { %p421_p4 = pnand %p420_p3, %p414_p0 }
   0xb   :  { %424 = shalt.err (!%p421_p4)
}
   0xc   :  { %s492_s21 = smov 64   ;;  %s493_s22 = smov 4  }
   0xd   :  { %34 = dma.hbm_to_vmem [thread:$0]  %s548_s1, 1024, %s29_s19, [#allocation6], %s492_s21, %s492_s21, %s493_s22  }
   0xe   :  { %s494_s25 = smov [#allocation2]   ;;  %s495_s27 = smov [#allocation7]  }
   0xf   :  { %s19_s26 = sshll.u32 %s494_s25, 4  ;;  %s42_s28 = sshll.u32 %s495_s27, 4  ;;  %s20_s26 = int_to_ptr.vmem [resolvable:$true] %s19_s26  ;;  %s43_s28 = int_to_ptr.vmem [resolvable:$true] %s42_s28 }
  0x10   :  { %s433_s29 = scalar_lea.vmem %s20_s26, 128  ;;  %p438_p6 = scmp.lt.s32.totalorder %s20_s26, %s20_s26 }
  0x11   :  { %p434_p5 = scmp.ne.s32.totalorder %s20_s26, %s433_s29  ;;  %p439_p7 = scmp.lt.s32.totalorder %s433_s29, %s433_s29 }
  0x13   :  { %p440_p8 = por %p439_p7, %p438_p6 }
  0x15   :  { %p441_p9 = pnand %p440_p8, %p434_p5 }
  0x17   :  { %444 = shalt.err (!%p441_p9)
}
  0x18   :  { %22 = dma.hbm_to_vmem [thread:$0]  %s547_s0, 128, %s20_s26, [#allocation3]  }
  0x19   :  { %s453_s7 = scalar_lea.vmem %s43_s28, 1024  ;;  %p458_p11 = scmp.lt.s32.totalorder %s43_s28, %s43_s28 }
  0x1a   :  { %p454_p10 = scmp.ne.s32.totalorder %s43_s28, %s453_s7  ;;  %p459_p12 = scmp.lt.s32.totalorder %s453_s7, %s453_s7 }
  0x1c   :  { %p460_p13 = por %p459_p12, %p458_p11 }
  0x1e   :  { %p461_p0 = pnand %p460_p13, %p454_p10 }
  0x20   :  { %464 = shalt.err (!%p461_p0)
}
  0x21   :  { %48 = dma.hbm_to_vmem [thread:$0]  %s550_s3, 1024, %s43_s28, [#allocation6], %s492_s21, %s492_s21, %s493_s22  }
  0x22   :  { %485 = dma.done.wait [#allocation3], 128  }
  0x23   :  { %486 = vsyncadd [#allocation3], 4294967168 }
  0x24   :  { %487 = dma.done.wait [#allocation6], 2048  }
  0x25   :  { %488 = vsyncadd [#allocation6], 4294965248  ;;  %v496_v0 = vmov 0.0   ;;  %vm497_vm0 = vmmov 0   ;;  %v389_v1 = vld [vmem:[#allocation5 + $0x38] sm:$0xff]   ;;  %v390_v2 = vld [vmem:[#allocation5 + $0x30] sm:$0xff]  }
  0x26   :  { %341 = vmatprep.subr.bf16.mxu0 %v496_v0  ;;  %357 = vmatprep.mubr.msk.bf16.mxu0 %vm497_vm0, %v496_v0  ;;  %v391_v3 = vld [vmem:[#allocation5 + $0x28] sm:$0xff]   ;;  %v397_v4 = vld [vmem:[#allocation7 + $0x38] sm:$0xff]   ;;  %v392_v5 = vld [vmem:[#allocation5 + $0x20] sm:$0xff]   ;;  %s498_s11 = smov [#allocation8]  }
  0x27   :  { %361 = vmatprep.subr.bf16.mxu1 %v496_v0  ;;  %377 = vmatprep.mubr.msk.bf16.mxu1 %vm497_vm0, %v496_v0  ;;  %v398_v6 = vld [vmem:[#allocation7 + $0x30] sm:$0xff]   ;;  %v393_v7 = vld [vmem:[#allocation5 + $0x18] sm:$0xff]   ;;  %v399_v8 = vld [vmem:[#allocation7 + $0x28] sm:$0xff]   ;;  %s295_s12 = sshll.u32 %s498_s11, 4  ;;  %s296_s12 = int_to_ptr.vmem [resolvable:$true] %s295_s12 }
  0x28   :  { %342 = vmatpush3.bf16.msra.mxu0 %v389_v1  ;;  %362 = vmatpush3.bf16.msra.mxu1 %v397_v4  ;;  %v394_v9 = vld [vmem:[#allocation5 + $0x10] sm:$0xff]   ;;  %v400_v10 = vld [vmem:[#allocation7 + $0x20] sm:$0xff]   ;;  %v395_v11 = vld [vmem:[#allocation5 + $0x8] sm:$0xff]   ;;  %p470_p2 = scmp.lt.s32.totalorder %s296_s12, %s296_s12 }
  0x29   :  { %343 = vmatprep.subr.bf16.mxu0 %v496_v0  ;;  %363 = vmatprep.subr.bf16.mxu1 %v496_v0  ;;  %v401_v12 = vld [vmem:[#allocation7 + $0x18] sm:$0xff]   ;;  %v396_v13 = vld [vmem:[#allocation5] sm:$0xff]   ;;  %v402_v15 = vld [vmem:[#allocation7 + $0x10] sm:$0xff]  }
  0x2a   :  { %v61_v14 = vld [vmem:[#allocation2] sm:$0xff]  ;;  %v403_v17 = vld [vmem:[#allocation7 + $0x8] sm:$0xff]   ;;  %v404_v18 = vld [vmem:[#allocation7] sm:$0xff]  }
  0x2b   :  { %v62_v16 = vpack.c.bf16 %v61_v14, %v61_v14  ;;  %v305_v19 = vld [vmem:[%s549_s2] ss:$0 sm:$0xff]  ;;  %s465_s2 = scalar_lea.vmem %s296_s12, 128 }
  0x2c   :  { %344 = vmatpush3.bf16.msra.mxu0 %v390_v2  ;;  %364 = vmatpush3.bf16.msra.mxu1 %v398_v6  ;;  %v314_v27 = vld [vmem:[%s551_s4] ss:$0 sm:$0xff]  ;;  %p466_p1 = scmp.ne.s32.totalorder %s296_s12, %s465_s2  ;;  %p471_p3 = scmp.lt.s32.totalorder %s465_s2, %s465_s2 }
  0x2d   :  { %345 = vmatprep.subr.bf16.mxu0 %v496_v0  ;;  %365 = vmatprep.subr.bf16.mxu1 %v496_v0 }
  0x2e   :  { %p472_p4 = por %p471_p3, %p470_p2 }
  0x30   :  { %346 = vmatpush3.bf16.msra.mxu0 %v391_v3  ;;  %366 = vmatpush3.bf16.msra.mxu1 %v399_v8  ;;  %p473_p5 = pnand %p472_p4, %p466_p1 }
  0x31   :  { %347 = vmatprep.subr.bf16.mxu0 %v496_v0  ;;  %367 = vmatprep.subr.bf16.mxu1 %v496_v0 }
  0x34   :  { %348 = vmatpush3.bf16.msra.mxu0 %v392_v5  ;;  %368 = vmatpush3.bf16.msra.mxu1 %v400_v10 }
  0x35   :  { %349 = vmatprep.subr.bf16.mxu0 %v496_v0  ;;  %369 = vmatprep.subr.bf16.mxu1 %v496_v0 }
  0x38   :  { %350 = vmatpush3.bf16.msra.mxu0 %v393_v7  ;;  %370 = vmatpush3.bf16.msra.mxu1 %v401_v12 }
  0x39   :  { %351 = vmatprep.subr.bf16.mxu0 %v496_v0  ;;  %371 = vmatprep.subr.bf16.mxu1 %v496_v0 }
  0x3c   :  { %352 = vmatpush3.bf16.msra.mxu0 %v394_v9  ;;  %372 = vmatpush3.bf16.msra.mxu1 %v402_v15 }
  0x3d   :  { %353 = vmatprep.subr.bf16.mxu0 %v496_v0  ;;  %373 = vmatprep.subr.bf16.mxu1 %v496_v0 }
  0x40   :  { %354 = vmatpush3.bf16.msra.mxu0 %v395_v11  ;;  %374 = vmatpush3.bf16.msra.mxu1 %v403_v17 }
  0x41   :  { %355 = vmatprep.subr.bf16.mxu0 %v496_v0  ;;  %375 = vmatprep.subr.bf16.mxu1 %v496_v0 }
  0x44   :  { %356 = vmatpush3.bf16.msra.mxu0 %v396_v13  ;;  %376 = vmatpush3.bf16.msra.mxu1 %v404_v18 }
  0x47   :  { %358 = vmatmul.mubr.bf16.vlgmr.msra.gmra.mxu0 %v62_v16 }
 0x107   :  { %v168_v20 = vpop.f32.mrf.mxu0 }
 0x108   :  { %v169_v21 = vadd.f32 %v305_v19, %v168_v20 }
 0x109   :  { %v359_v22 = vpop.f32.mrf.mxu0 }
 0x10a   :  { %v174_v23 = vmax.f32 %v169_v21, 0.0 }
 0x10b   :  { %v171_v24 = vpop.f32.mrf.mxu0 }
 0x10c   :  { %v175_v25 = vpack.c.bf16 %v174_v23, %v174_v23 }
 0x10d   :  { %v360_v26 = vpop.f32.mrf.mxu0 }
 0x10e   :  { %378 = vmatmul.mubr.bf16.vlgmr.msra.gmra.mxu1 %v175_v25 }
 0x1ce   :  { %v281_v28 = vpop.f32.mrf.mxu1 }
 0x1cf   :  { %v282_v29 = vadd.f32 %v314_v27, %v281_v28 }
 0x1d0   :  { %v379_v30 = vpop.f32.mrf.mxu1 }
 0x1d1   :  { %v287_v31 = vmax.f32 %v282_v29, 0.0 }
 0x1d2   :  { %v284_v32 = vpop.f32.mrf.mxu1 }
 0x1d3   :  { %288 = vst [vmem:[#allocation8] sm:$0xff] %v287_v31 }
 0x1d4   :  { %v380_v33 = vpop.f32.mrf.mxu1 }
 0x1d5   :  { %476 = shalt.err (!%p473_p5)
}
 0x1d6   :  { %298 = dma.vmem_to_hbm [thread:$0]  %s296_s12, 128, %s552_s5, [#allocation4]  }
 0x1d7   :  { %489 = dma.done.wait [#allocation4], 128  }
 0x1d8   :  { %490 = vsyncadd [#allocation4], 4294967168 }
 0x1d9   :  { %302 = vsyncpa [#allocation3], 1 }
 0x1da   :  { %303 = vsyncpa [#allocation6], 1 }
 0x1db   :  { %304 = vsyncpa [#allocation4], 1 }

</bundles_post_ra>
